<compile_context>
chip_gen: v6e
topology: v6e:2x2x1
jax: 0.10.0
libtpu: 0.0.40
codegen_flags: <defaults>
</compile_context>

<pallas_src>
import functools

import jax
import jax.numpy as jnp
from jax.experimental import pallas as pl
from jax.experimental.pallas import tpu as pltpu

LANE = 128
SUBLANE = 8


def _round_up(x: int, m: int) -> int:
    return ((x + m - 1) // m) * m


def _tpu_device_kind() -> str:
    try:
        return jax.devices()[0].device_kind.lower()
    except Exception:  # pragma: no cover - defensive
        return ""


def _apply_act(y, act, act_dtype):
    # Cast before the transcendental: on v6e/v7x the EUP/VPU have bf16 paths,
    # so bf16 tanh/sigmoid roughly doubles throughput on the saturating slot.
    y = y.astype(act_dtype)
    if act == "tanh":
        return jnp.tanh(y)
    if act == "relu":
        return jnp.maximum(y, 0.0).astype(act_dtype)
    if act == "sigmoid":
        return jax.nn.sigmoid(y)
    return y


def _fused_mlp_kernel(x_ref, *refs, activations, first_layer_k, use_vpu_first,
                      act_dtype, last_chunk_cols):
    """Fused MLP forward on one batch tile.

    refs = (w0, b0, w1, b1, ..., w_{L-1}, b_{L-1}, o_ref)
      x_ref : (tm, Din0)        batch tile of the (padded) input, f32
      w_i   : (Din_i, Dout_i)   full (padded) weight, bf16 (f32 for VPU layer)
      b_i   : (1, Dout_i)       full (padded) bias row, f32
      o_ref : (tm, Dout_last)   lane-dense output tile, f32
    """
    o_ref = refs[-1]
    wb = refs[:-1]
    n_layers = len(activations)

    h = x_ref[...]
    for li in range(n_layers):
        act = activations[li]
        is_last = li == n_layers - 1
        b = wb[2 * li + 1][...].astype(jnp.float32)  # (1, Dout_pad)

        if li == 0 and use_vpu_first:
            # Tiny contraction dim: rank-1 VPU accumulation; bias folded into
            # the first FMA so no separate broadcast pass is materialized.
            hf = h.astype(jnp.float32)
            wf = wb[0][...].astype(jnp.float32)
            y = b + hf[:, 0:1] * wf[0:1, :]
            for k in range(1, first_layer_k):
                y = y + hf[:, k:k + 1] * wf[k:k + 1, :]
            h = _apply_act(y, act, act_dtype)
            if is_last:
                o_ref[...] = h.astype(o_ref.dtype)
            continue

        hb = h.astype(jnp.bfloat16)  # single-pass bf16 MXU operands
        w_ref = wb[2 * li]

        if is_last and last_chunk_cols:
            # Chunk the wide last layer into lane-dense column blocks so the
            # sigmoid of chunk j (EUP) overlaps the matmul of chunk j+1 (MXU)
            # instead of serializing dot -> sigmoid on the whole slab.
            n_out = w_ref.shape[1]
            for c0 in range(0, n_out, last_chunk_cols):
                c1 = c0 + last_chunk_cols
                yc = jnp.dot(hb, w_ref[:, c0:c1],
                             preferred_element_type=jnp.float32) + b[:, c0:c1]
                o_ref[:, c0:c1] = _apply_act(yc, act, act_dtype).astype(o_ref.dtype)
        else:
            y = jnp.dot(hb, w_ref[...], preferred_element_type=jnp.float32) + b
            h = _apply_act(y, act, act_dtype)
            if is_last:
                o_ref[...] = h.astype(o_ref.dtype)


class PallasDecoder:
    """JAX/Pallas equivalent of the PyTorch Decoder module (fused forward)."""

    def __init__(
        self,
        out_features: int = 28 * 28,
        hidden_features=500,
        latent_features: int = 2,
        nonlinearity: str = "tanh",
        key=None,
    ):
        if nonlinearity not in ("tanh", "relu"):
            raise ValueError(f"Unknown activation function: {nonlinearity}")
        if isinstance(hidden_features, int):
            hidden_features = (hidden_features,)
        elif isinstance(hidden_features, list):
            hidden_features = tuple(hidden_features)
        self.out_features = out_features
        self.hidden_features = hidden_features
        self.latent_features = latent_features
        self.nonlinearity = nonlinearity

        # ---- Hardware-generation detection (static, host side) ----------
        kind = _tpu_device_kind()
        self._two_tc = ("v7" in kind) or ("v4" in kind) or ("v5p" in kind)
        self._use_core_parallel = "v7" in kind
        bf16_eup = ("v6" in kind) or ("v7" in kind)
        self._act_dtype = jnp.bfloat16 if bf16_eup else jnp.float32

        # ---- Parameter init (matches PyTorch's U(-1/sqrt(fan_in), +..)) --
        features = (latent_features,) + hidden_features + (out_features,)
        if key is None:
            key = jax.random.PRNGKey(42)
        self.params = []
        for i in range(len(features) - 1):
            fan_in, fan_out = features[i], features[i + 1]
            key, kw, kb = jax.random.split(key, 3)
            bound = 1.0 / (fan_in ** 0.5)
            w = jax.random.uniform(kw, (fan_in, fan_out), jnp.float32, -bound, bound)
            b = jax.random.uniform(kb, (fan_out,), jnp.float32, -bound, bound)
            self.params.append((w, b))

        # ---- Lane-padded parameters (zero padding keeps the math exact:
        # padded activation columns stay 0 through tanh/relu and only hit
        # zero weight rows of the next layer). -----------------------------
        self._use_vpu_first = latent_features <= 4   # MXU once K exceeds ~4
        in0_pad = (latent_features if self._use_vpu_first
                   else _round_up(latent_features, LANE))
        self._pad_dims = [in0_pad] + [_round_up(d, LANE) for d in features[1:]]
        self._padded_params = []
        for li, (w, b) in enumerate(self.params):
            din, dout = w.shape
            din_p, dout_p = self._pad_dims[li], self._pad_dims[li + 1]
            # Weights stored bf16 for single-pass MXU; the VPU first layer
            # keeps f32 (it is tiny and its math runs in f32 anyway).
            w_dtype = jnp.float32 if (li == 0 and self._use_vpu_first) else jnp.bfloat16
            w_p = jnp.zeros((din_p, dout_p), w_dtype).at[:din, :dout].set(
                w.astype(w_dtype))
            b_p = jnp.zeros((1, dout_p), jnp.float32).at[0, :dout].set(b)
            self._padded_params.append((w_p, b_p))

        self._activations = tuple(
            "sigmoid" if li == len(self.params) - 1 else nonlinearity
            for li in range(len(self.params))
        )

        self._param_bytes = int(sum(
            int(w.size) * w.dtype.itemsize + int(b.size) * b.dtype.itemsize
            for w, b in self._padded_params))
        # Only request single-buffering of the invariant weights when the 2x
        # default double-buffer actually matters (keeps the proven path for
        # small models).
        self._single_buffer = hasattr(pl, "Buffered") and self._param_bytes > (4 << 20)

        # Chunk the last layer's columns when it is wide enough to overlap
        # MXU and EUP work.
        out_pad = self._pad_dims[-1]
        if out_pad >= 512:
            self._last_chunk = 256 if out_pad % 256 == 0 else 128
        else:
            self._last_chunk = 0

        # jit the whole pad -> pallas_call -> slice wrapper (cached per shape).
        self._jit_forward = jax.jit(self._forward_impl)

    # ------------------------------------------------------------------ #
    def _resident_spec(self, shape):
        # Grid-invariant weight/bias: constant index_map keeps it VMEM-resident.
        if self._single_buffer:
            return pl.BlockSpec(shape, lambda i: (0, 0),
                                pipeline_mode=pl.Buffered(1))
        return pl.BlockSpec(shape, lambda i: (0, 0))

    def _choose_tile(self, B):
        """Generation-aware batch tile: 1 fat tile on 1-TC chips, 2 on 2-TC."""
        max_w = max(self._pad_dims)
        # Keep live activation slabs comfortably inside VMEM.
        vmem_cap = max(SUBLANE, ((24 << 20) // (4 * max_w)) // SUBLANE * SUBLANE)
        if self._two_tc:
            tm = min(512, vmem_cap, _round_up(-(-B // 2), SUBLANE))
            b_pad = _round_up(B, 2 * tm)          # even grid for core sharding
        else:
            tm = min(1024, vmem_cap, _round_up(B, SUBLANE))
            b_pad = _round_up(B, tm)
        return tm, b_pad

    def _forward_impl(self, z):
        B, latent = z.shape
        assert latent == self.latent_features, "latent dim mismatch"

        in_dim_p = self._pad_dims[0]
        out_dim_p = self._pad_dims[-1]
        tm, b_pad = self._choose_tile(B)
        grid_n = b_pad // tm

        z_p = jnp.zeros((b_pad, in_dim_p), jnp.float32).at[:B, :latent].set(
            z.astype(jnp.float32))

        flat_params = []
        in_specs = [pl.BlockSpec((tm, in_dim_p), lambda i: (i, 0))]
        for w_p, b_p in self._padded_params:
            flat_params.extend([w_p, b_p])
            in_specs.append(self._resident_spec(w_p.shape))
            in_specs.append(self._resident_spec(b_p.shape))

        flops = 2 * b_pad * sum(int(w.shape[0]) * int(w.shape[1])
                                for w, _ in self._padded_params)
        transcendentals = b_pad * sum(int(w.shape[1])
                                      for w, _ in self._padded_params)
        bytes_accessed = int(z_p.size) * 4 + self._param_bytes + b_pad * out_dim_p * 4

        # Explicit VMEM budget: params (1x or 2x), double-buffered z/out tiles,
        # plus a generous allowance for live activation temporaries.
        buf_mult = 1 if self._single_buffer else 2
        max_w = max(self._pad_dims)
        vmem_need = (self._param_bytes * buf_mult
                     + 2 * tm * in_dim_p * 4
                     + 2 * tm * out_dim_p * 4
                     + 4 * tm * max_w * 4)
        vmem_limit = int(min(max(vmem_need + (4 << 20), 32 << 20), 64 << 20))

        if (self._use_core_parallel and grid_n >= 2 and grid_n % 2 == 0
                and hasattr(pltpu, "CORE_PARALLEL")):
            batch_sem = pltpu.CORE_PARALLEL
        else:
            batch_sem = "parallel"

        kernel = functools.partial(
            _fused_mlp_kernel,
            activations=self._activations,
            first_layer_k=self.latent_features,
            use_vpu_first=self._use_vpu_first,
            act_dtype=self._act_dtype,
            last_chunk_cols=self._last_chunk,
        )

        out = pl.pallas_call(
            kernel,
            out_shape=jax.ShapeDtypeStruct((b_pad, out_dim_p), jnp.float32),
            grid_spec=pltpu.PrefetchScalarGridSpec(
                num_scalar_prefetch=0,
                grid=(grid_n,),
                in_specs=in_specs,
                out_specs=pl.BlockSpec((tm, out_dim_p), lambda i: (i, 0)),
            ),
            compiler_params=pltpu.CompilerParams(
                dimension_semantics=(batch_sem,),
                vmem_limit_bytes=vmem_limit,
            ),
            cost_estimate=pl.CostEstimate(
                flops=flops,
                transcendentals=transcendentals,
                bytes_accessed=bytes_accessed,
            ),
        )(z_p, *flat_params)

        # Strip batch and lane padding.
        return out[:B, : self.out_features]

    def __call__(self, z):
        return self._jit_forward(z)


def reference_forward(decoder: PallasDecoder, z):
    """Pure-JAX f32 reference for correctness checking."""
    h = z.astype(jnp.float32)
    n_layers = len(decoder.params)
    for li, (w, b) in enumerate(decoder.params):
        h = h @ w + b
        if li == n_layers - 1:
            h = jax.nn.sigmoid(h)
        elif decoder.nonlinearity == "tanh":
            h = jnp.tanh(h)
        else:
            h = jnp.maximum(h, 0.0)
    return h


if __name__ == "__main__":
    key = jax.random.PRNGKey(0)
    batch = 16
    latent = 2
    hidden = 32
    out_feats = 64

    z = jax.random.normal(key, (batch, latent), dtype=jnp.float32)

    dec = PallasDecoder(
        out_features=out_feats,
        hidden_features=hidden,
        latent_features=latent,
        nonlinearity="tanh",
        key=jax.random.PRNGKey(1),
    )

    theta = jax.block_until_ready(dec(z))
    ref = reference_forward(dec, z)
    assert theta.shape == (batch, out_feats)
    # bf16 MXU operands / bf16 transcendentals on v6e+ => relaxed tolerance
    # vs the pure-f32 reference.
    assert jnp.max(jnp.abs(theta - ref)) < 3e-2, "mismatch vs reference"

    # Also exercise a batch that is NOT a multiple of 8 (padding path).
    z_odd = jax.random.normal(jax.random.PRNGKey(2), (5, latent), dtype=jnp.float32)
    theta_odd = jax.block_until_ready(dec(z_odd))
    ref_odd = reference_forward(dec, z_odd)
    assert theta_odd.shape == (5, out_feats)
    assert jnp.max(jnp.abs(theta_odd - ref_odd)) < 3e-2, "odd-batch mismatch"

    print("KERNEL_OK")
</pallas_src>

<mosaic_0001>
module attributes {stable_mosaic.version = 11 : i64} {
  func.func @_fused_mlp_kernel(%arg0: i32, %arg1: memref<16x2xf32, #tpu.memory_space<vmem>>, %arg2: memref<2x128xf32, #tpu.memory_space<vmem>>, %arg3: memref<1x128xf32, #tpu.memory_space<vmem>>, %arg4: memref<128x128xbf16, #tpu.memory_space<vmem>>, %arg5: memref<1x128xf32, #tpu.memory_space<vmem>>, %arg6: memref<16x128xf32, #tpu.memory_space<vmem>>) attributes {dimension_semantics = [#tpu.dimension_semantics<parallel>], iteration_bounds = array<i64: 1>, scalar_prefetch = 0 : i64, scratch_operands = 0 : i64, tpu.core_type = #tpu.core_type<tc>, window_params = [{transform_indices = @transform_0, window_bounds = array<i64: 16, 2>}, {pipeline_mode = #tpu.pipeline_mode<synchronous>, transform_indices = @transform_1, window_bounds = array<i64: 2, 128>}, {pipeline_mode = #tpu.pipeline_mode<synchronous>, transform_indices = @transform_2, window_bounds = array<i64: 1, 128>}, {pipeline_mode = #tpu.pipeline_mode<synchronous>, transform_indices = @transform_3, window_bounds = array<i64: 128, 128>}, {pipeline_mode = #tpu.pipeline_mode<synchronous>, transform_indices = @transform_4, window_bounds = array<i64: 1, 128>}, {transform_indices = @transform_5, window_bounds = array<i64: 16, 128>}]} {
    %c0 = arith.constant 0 : index
    %c0_0 = arith.constant 0 : index
    %0 = vector.load %arg1[%c0, %c0_0] : memref<16x2xf32, #tpu.memory_space<vmem>>, vector<16x2xf32>
    %c0_1 = arith.constant 0 : index
    %c0_2 = arith.constant 0 : index
    %1 = vector.load %arg3[%c0_1, %c0_2] : memref<1x128xf32, #tpu.memory_space<vmem>>, vector<1x128xf32>
    %c0_3 = arith.constant 0 : index
    %c0_4 = arith.constant 0 : index
    %2 = vector.load %arg2[%c0_3, %c0_4] : memref<2x128xf32, #tpu.memory_space<vmem>>, vector<2x128xf32>
    %3 = vector.extract_strided_slice %0 {offsets = [0, 0], sizes = [16, 1], strides = [1, 1]} : vector<16x2xf32> to vector<16x1xf32>
    %4 = vector.extract_strided_slice %2 {offsets = [0, 0], sizes = [1, 128], strides = [1, 1]} : vector<2x128xf32> to vector<1x128xf32>
    %5 = vector.broadcast %3 : vector<16x1xf32> to vector<16x128xf32>
    %6 = vector.broadcast %4 : vector<1x128xf32> to vector<16x128xf32>
    %7 = arith.mulf %5, %6 : vector<16x128xf32>
    %8 = vector.broadcast %1 : vector<1x128xf32> to vector<16x128xf32>
    %9 = arith.addf %8, %7 : vector<16x128xf32>
    %10 = vector.extract_strided_slice %0 {offsets = [0, 1], sizes = [16, 1], strides = [1, 1]} : vector<16x2xf32> to vector<16x1xf32>
    %11 = vector.extract_strided_slice %2 {offsets = [1, 0], sizes = [1, 128], strides = [1, 1]} : vector<2x128xf32> to vector<1x128xf32>
    %12 = vector.broadcast %10 : vector<16x1xf32> to vector<16x128xf32>
    %13 = vector.broadcast %11 : vector<1x128xf32> to vector<16x128xf32>
    %14 = arith.mulf %12, %13 : vector<16x128xf32>
    %15 = arith.addf %9, %14 : vector<16x128xf32>
    %16 = math.tanh %15 : vector<16x128xf32>
    %c0_5 = arith.constant 0 : index
    %c0_6 = arith.constant 0 : index
    %17 = vector.load %arg5[%c0_5, %c0_6] : memref<1x128xf32, #tpu.memory_space<vmem>>, vector<1x128xf32>
    %18 = arith.truncf %16 : vector<16x128xf32> to vector<16x128xbf16>
    %c0_7 = arith.constant 0 : index
    %c0_8 = arith.constant 0 : index
    %19 = vector.load %arg4[%c0_7, %c0_8] : memref<128x128xbf16, #tpu.memory_space<vmem>>, vector<128x128xbf16>
    %cst = arith.constant dense<0.000000e+00> : vector<16x128xf32>
    %20 = tpu.matmul %18, %19, %cst {dimension_numbers = #tpu.dot_dimension_numbers<[1], [0], [0], [1], [0, 0, 1, 1], [], []>} : vector<16x128xbf16>, vector<128x128xbf16>, vector<16x128xf32> -> vector<16x128xf32>
    %21 = vector.broadcast %17 : vector<1x128xf32> to vector<16x128xf32>
    %22 = arith.addf %20, %21 : vector<16x128xf32>
    %23 = arith.negf %22 : vector<16x128xf32>
    %24 = math.exp %23 : vector<16x128xf32>
    %cst_9 = arith.constant 1.000000e+00 : f32
    %25 = vector.broadcast %cst_9 : f32 to vector<16x128xf32>
    %26 = arith.addf %25, %24 : vector<16x128xf32>
    %27 = arith.divf %25, %26 : vector<16x128xf32>
    %c0_10 = arith.constant 0 : index
    %c0_11 = arith.constant 0 : index
    %28 = vector.load %arg6[%c0_10, %c0_11] : memref<16x128xf32, #tpu.memory_space<vmem>>, vector<16x128xf32>
    tpu.vector_store %arg6[%c0_10, %c0_11], %27 {strides = array<i32>} : memref<16x128xf32, #tpu.memory_space<vmem>>, vector<16x128xf32>,
    return
  }
  func.func @transform_0(%arg0: i32) -> (i32, i32) {
    %c0_i32 = arith.constant 0 : i32
    %c0_i32_0 = arith.constant 0 : i32
    return %arg0, %c0_i32 : i32, i32
  }
  func.func @transform_1(%arg0: i32) -> (i32, i32) {
    %c0_i32 = arith.constant 0 : i32
    %c0_i32_0 = arith.constant 0 : i32
    %c0_i32_1 = arith.constant 0 : i32
    return %c0_i32, %c0_i32_0 : i32, i32
  }
  func.func @transform_2(%arg0: i32) -> (i32, i32) {
    %c0_i32 = arith.constant 0 : i32
    %c0_i32_0 = arith.constant 0 : i32
    %c0_i32_1 = arith.constant 0 : i32
    return %c0_i32, %c0_i32_0 : i32, i32
  }
  func.func @transform_3(%arg0: i32) -> (i32, i32) {
    %c0_i32 = arith.constant 0 : i32
    %c0_i32_0 = arith.constant 0 : i32
    %c0_i32_1 = arith.constant 0 : i32
    return %c0_i32, %c0_i32_0 : i32, i32
  }
  func.func @transform_4(%arg0: i32) -> (i32, i32) {
    %c0_i32 = arith.constant 0 : i32
    %c0_i32_0 = arith.constant 0 : i32
    %c0_i32_1 = arith.constant 0 : i32
    return %c0_i32, %c0_i32_0 : i32, i32
  }
  func.func @transform_5(%arg0: i32) -> (i32, i32) {
    %c0_i32 = arith.constant 0 : i32
    %c0_i32_0 = arith.constant 0 : i32
    return %arg0, %c0_i32 : i32, i32
  }
}

</mosaic_0001>

<bundles_post_ra>
// kernel: _forward_impl.1
= control target key start
LH: loop header
LB: loop body
LE: loop exit
PB: predicated region body
PF: predicated region fallthrough
CT: control target
= control target key end

     0   :  { %10 = vsyncpa [#allocation3], 0  ;;  %s405_s0 = inlined_call_operand.vmem [shape: f32[16,2], index: 0, kind: input, shape index: {}]   ;;  %s406_s1 = inlined_call_operand.vmem [shape: f32[2,128], index: 1, kind: input, shape index: {}]   ;;  %s407_s2 = inlined_call_operand.vmem [shape: f32[1,128], index: 2, kind: input, shape index: {}]   ;;  %s408_s3 = inlined_call_operand.hbm [shape: bf16[128,128], index: 3, kind: input, shape index: {}]   ;;  %s409_s4 = inlined_call_operand.vmem [shape: f32[1,128], index: 4, kind: input, shape index: {}]   ;;  %s410_s5 = inlined_call_operand.hbm [shape: f32[16,128], index: 5, kind: output, shape index: {}]  }
   0x1   :  { %11 = vsyncpa [#allocation4], 0  ;;  %s344_s18 = smov [#allocation2]  }
   0x2   :  { %s23_s19 = sshll.u32 %s344_s18, 4  ;;  %s24_s19 = int_to_ptr.vmem [resolvable:$true] %s23_s19 }
   0x3   :  { %s308_s20 = scalar_lea.vmem %s24_s19, 1024  ;;  %p313_p1 = scmp.lt.s32.totalorder %s24_s19, %s24_s19 }
   0x4   :  { %p309_p0 = scmp.ne.s32.totalorder %s24_s19, %s308_s20  ;;  %p314_p2 = scmp.lt.s32.totalorder %s308_s20, %s308_s20 }
   0x6   :  { %p315_p3 = por %p314_p2, %p313_p1 }
   0x8   :  { %p316_p4 = pnand %p315_p3, %p309_p0 }
   0xa   :  { %319 = shalt.err (!%p316_p4)
}
   0xb   :  { %s345_s21 = smov 64   ;;  %s346_s22 = smov 4  }
   0xc   :  { %29 = dma.hbm_to_vmem [thread:$0]  %s408_s3, 1024, %s24_s19, [#allocation3], %s345_s21, %s345_s21, %s346_s22  }
   0xd   :  { %340 = dma.done.wait [#allocation3], 1024  }
   0xe   :  { %341 = vsyncadd [#allocation3], 4294966272  ;;  %v347_v0 = vmov 1   ;;  %v348_v1 = vmov 0   ;;  %v349_v2 = vmov 0.0   ;;  %v36_v3 = vld [vmem:[%s405_s0] sm:$0xff]  ;;  %v50_v13 = vlaneseq }
   0xf   :  { %278 = vset.pattern.permute.xlu1 %v347_v0  ;;  %277 = vset.pattern.permute.xlu0 %v348_v1  ;;  %v280_v4 = vld [vmem:[#allocation2 + $0x38] sm:$0xff]   ;;  %v37_v5 = vld [vmem:[%s405_s0 + $0x8] sm:$0xff]  ;;  %v281_v6 = vld [vmem:[#allocation2 + $0x30] sm:$0xff]   ;;  %vm350_vm0 = vmmov 0  }
  0x10   :  { %247 = vmatprep.subr.bf16.mxu0 %v349_v2  ;;  %65 = vperm.xlu1 %278, %v36_v3   ;;  %v282_v7 = vld [vmem:[#allocation2 + $0x28] sm:$0xff]   ;;  %v283_v8 = vld [vmem:[#allocation2 + $0x20] sm:$0xff]   ;;  %v284_v9 = vld [vmem:[#allocation2 + $0x18] sm:$0xff]   ;;  %v51_v14 = vshrl.u32 %v50_v13, 7 }
  0x11   :  { %42 = vperm.xlu0 %277, %v36_v3   ;;  %248 = vmatpush3.bf16.msra.mxu0 %v280_v4  ;;  %v285_v10 = vld [vmem:[#allocation2 + $0x10] sm:$0xff]   ;;  %v286_v11 = vld [vmem:[#allocation2 + $0x8] sm:$0xff]   ;;  %v287_v12 = vld [vmem:[#allocation2] sm:$0xff]  }
  0x12   :  { %249 = vmatprep.subr.bf16.mxu0 %v349_v2  ;;  %263 = vmatprep.mubr.msk.bf16.mxu0 %vm350_vm0, %v349_v2  ;;  %v52_v15 = vsub.s32 0, %v51_v14  ;;  %v39_v16 = vld [vmem:[%s406_s1] sm:$0x3]  ;;  %v74_v17 = vsub.s32 1, %v51_v14 }
  0x13   :  { %v226_v21 = vld [vmem:[%s407_s2] ss:$0 sm:$0xff]  ;;  %s351_s2 = smov [#allocation5]  }
  0x14   :  { %69 = vperm.xlu1 %278, %v37_v5   ;;  %v53_v18 = vrot.slane %v39_v16, %v52_v15  ;;  %v75_v19 = vrot.slane %v39_v16, %v74_v17  ;;  %v227_v36 = vld [vmem:[%s409_s4] ss:$0 sm:$0xff]  ;;  %s214_s7 = sshll.u32 %s351_s2, 4  ;;  %s215_s7 = int_to_ptr.vmem [resolvable:$true] %s214_s7 }
  0x15   :  { %47 = vperm.xlu0 %277, %v37_v5   ;;  %250 = vmatpush3.bf16.msra.mxu0 %v281_v6  ;;  %s320_s4 = scalar_lea.vmem %s215_s7, 256  ;;  %p325_p6 = scmp.lt.s32.totalorder %s215_s7, %s215_s7 }
  0x16   :  { %251 = vmatprep.subr.bf16.mxu0 %v349_v2  ;;  %p321_p5 = scmp.ne.s32.totalorder %s215_s7, %s320_s4  ;;  %p326_p7 = scmp.lt.s32.totalorder %s320_s4, %s320_s4 }
  0x18   :  { %p327_p8 = por %p326_p7, %p325_p6 }
  0x19   :  { %279 = vset.pattern.permute.xlu0 %v347_v0  ;;  %252 = vmatpush3.bf16.msra.mxu0 %v282_v7 }
  0x1a   :  { %253 = vmatprep.subr.bf16.mxu0 %v349_v2  ;;  %p328_p9 = pnand %p327_p8, %p321_p5 }
  0x1d   :  { %254 = vmatpush3.bf16.msra.mxu0 %v283_v8 }
  0x1e   :  { %255 = vmatprep.subr.bf16.mxu0 %v349_v2 }
  0x21   :  { %256 = vmatpush3.bf16.msra.mxu0 %v284_v9 }
  0x22   :  { %257 = vmatprep.subr.bf16.mxu0 %v349_v2 }
  0x25   :  { %258 = vmatpush3.bf16.msra.mxu0 %v285_v10 }
  0x26   :  { %259 = vmatprep.subr.bf16.mxu0 %v349_v2 }
  0x29   :  { %260 = vmatpush3.bf16.msra.mxu0 %v286_v11 }
  0x2a   :  { %261 = vmatprep.subr.bf16.mxu0 %v349_v2 }
  0x2d   :  { %262 = vmatpush3.bf16.msra.mxu0 %v287_v12 }
  0x8b   :  { %v66_v20 = vpop.permute.xlu1 %65 }
  0x8c   :  { %v43_v22 = vpop.permute.xlu0 %42  ;;  %v76_v24 = vmul.f32 %v75_v19, %v66_v20 }
  0x8d   :  { %v54_v23 = vmul.f32 %v53_v18, %v43_v22 }
  0x8f   :  { %v62_v25 = vadd.f32 %v226_v21, %v54_v23  ;;  %v70_v26 = vpop.permute.xlu1 %69 }
  0x90   :  { %v48_v27 = vpop.permute.xlu0 %47  ;;  %v77_v30 = vmul.f32 %v75_v19, %v70_v26 }
  0x91   :  { %v55_v28 = vmul.f32 %v53_v18, %v48_v27  ;;  %v78_v29 = vadd.f32 %v76_v24, %v62_v25 }
  0x93   :  { %v63_v31 = vadd.f32 %v226_v21, %v55_v28  ;;  %288 = vtanh.f32 %v78_v29 }
  0x95   :  { %v79_v32 = vadd.f32 %v77_v30, %v63_v31 }
  0x97   :  { %290 = vtanh.f32 %v79_v32 }
  0xa0   :  { %v289_v33 = vpop.eup %288 }
  0xa4   :  { %v291_v34 = vpop.eup %290 }
  0xa5   :  { %v83_v35 = vpack.c.bf16 %v291_v34, %v289_v33 }
  0xa7   :  { %264 = vmatmul.mubr.bf16.vlgmr.msra.gmra.mxu0 %v83_v35 }
 0x167   :  { %v188_v37 = vpop.f32.mrf.mxu0 }
 0x168   :  { %v189_v38 = vadd.f32 %v227_v36, %v188_v37 }
 0x169   :  { %v265_v39 = vpop.f32.mrf.mxu0 }
 0x16a   :  { %v236_v40 = vmul.f32 -1.442695, %v189_v38 }
 0x16b   :  { %v191_v41 = vpop.f32.mrf.mxu0 }
 0x16c   :  { %292 = vpow2.f32 %v236_v40  ;;  %v192_v42 = vadd.f32 %v227_v36, %v191_v41 }
 0x16d   :  { %v266_v43 = vpop.f32.mrf.mxu0 }
 0x16e   :  { %v237_v44 = vmul.f32 -1.442695, %v192_v42 }
 0x170   :  { %294 = vpow2.f32 %v237_v44 }
 0x179   :  { %v293_v45 = vpop.eup %292 }
 0x17a   :  { %v201_v46 = vadd.f32 1.0, %v293_v45 }
 0x17c   :  { %296 = vrcp.f32 %v201_v46 }
 0x17d   :  { %v295_v47 = vpop.eup %294 }
 0x17e   :  { %v202_v48 = vadd.f32 1.0, %v295_v47 }
 0x180   :  { %298 = vrcp.f32 %v202_v48 }
 0x189   :  { %v297_v49 = vpop.eup %296 }
 0x18a   :  { %207 = vst [vmem:[#allocation5] sm:$0xff] %v297_v49 }
 0x18d   :  { %v299_v50 = vpop.eup %298 }
 0x18e   :  { %208 = vst [vmem:[#allocation5 + $0x8] sm:$0xff] %v299_v50 }
 0x18f   :  { %331 = shalt.err (!%p328_p9)
}
 0x190   :  { %s352_s8 = smov 128   ;;  %s353_s9 = smov 8  }
 0x191   :  { %220 = dma.vmem_to_hbm [thread:$0]  %s215_s7, 256, %s410_s5, [#allocation4], %s352_s8, %s352_s8, %s353_s9  }
 0x192   :  { %342 = dma.done.wait [#allocation4], 256  }
 0x193   :  { %343 = vsyncadd [#allocation4], 4294967040 }
 0x194   :  { %224 = vsyncpa [#allocation3], 1 }
 0x195   :  { %225 = vsyncpa [#allocation4], 1 }

</bundles_post_ra>
